<compile_context>
chip_gen: v5e
topology: v5e:2x2
jax: 0.10.0
libtpu: 0.0.40
codegen_flags: <defaults>
</compile_context>

<pallas_src>
import jax
import jax.numpy as jnp
from jax import lax
from jax.experimental import pallas as pl
from jax.experimental.pallas import tpu as pltpu

# Conv / problem constants
C_OUT = 32
K = 3
PAD = 3
DIL = 2
H_IN = 30
W_IN = 30
H_PAD = H_IN + 2 * PAD                     # 36
W_PAD = W_IN + 2 * PAD                     # 36
H_OUT = H_PAD - DIL * (K - 1)              # 32
W_OUT = W_PAD - DIL * (K - 1)              # 32
N_OUT = H_OUT * W_OUT                      # 1024 (lane-dense output width)
K_TAPS = K * K                             # 9
K_PAD = 16                                 # 9 taps + 1 bias column + 6 zero cols
STRIP_LEN = H_PAD * W_OUT                  # 1152 (one flattened column strip)

SUB_CONSTS = (0.000358, 3.58e-06, 3.583286e-06, 3.58328675e-06)


def conv_kernel(strips_ref, w_ref, o_ref, p_ref):
    """Single invocation: build P in VMEM, one MXU matmul, lane-dense store.

    strips_ref : (3, 1152)      f32 VMEM  column-shifted padded-plane strips;
                                          strips[kw, r*32 + c] = xpad[r, c + 2*kw]
    w_ref      : (C_OUT, K_PAD) f32 VMEM  taps (cols 0..8), folded bias (col 9),
                                          zeros (cols 10..15)
    o_ref      : (C_OUT, N_OUT) f32 VMEM  lane-dense output slab
    p_ref      : (K_PAD, N_OUT) f32 VMEM  scratch patch matrix
    """
    # Rows 10..15 must be zero (paired weight columns are zero, but 0*garbage
    # from stale VMEM could be NaN); row 9 is the all-ones bias row.
    p_ref[...] = jnp.zeros_like(p_ref)
    p_ref[pl.ds(K_TAPS, 1), :] = jnp.ones((1, N_OUT), dtype=jnp.float32)

    # im2col in-kernel: each dilated window is a contiguous 1024-lane slice of
    # a strip row at lane offset 64*kh (0 / 64 / 128).
    for kh in range(K):
        for kw in range(K):
            t = kh * K + kw
            off = kh * DIL * W_OUT
            p_ref[pl.ds(t, 1), :] = strips_ref[pl.ds(kw, 1), pl.ds(off, N_OUT)]

    # One small MXU matmul; bias + scalar subs already folded into w_ref/p_ref.
    o_ref[...] = jnp.dot(w_ref[...], p_ref[...],
                         preferred_element_type=jnp.float32)


@jax.jit
def model_forward(x_nchw, weight, bias):
    """x_nchw: (1, 1, 30, 30) f32; weight: (32, 1, 3, 3); bias: (32,)."""
    x_plane = x_nchw[0, 0].astype(jnp.float32)                       # (30, 30)
    x_pad = jnp.pad(x_plane, PAD)                                    # (36, 36)

    # Tiny layout plumbing (13.5 KiB): three column-shifted views of the padded
    # plane, flattened row-major (the reshape is a free bitcast).
    strips = jnp.stack(
        [x_pad[:, kw * DIL: kw * DIL + W_OUT] for kw in range(K)], axis=0
    ).reshape(K, STRIP_LEN)                                          # (3, 1152)

    # Augmented weights: taps | folded bias column | zero padding.
    w_flat = weight.reshape(C_OUT, K_TAPS).astype(jnp.float32)       # (32, 9)
    b_adj = (bias.astype(jnp.float32)
             - jnp.float32(sum(SUB_CONSTS)))[:, None]                # (32, 1)
    w_aug = jnp.concatenate(
        [w_flat, b_adj,
         jnp.zeros((C_OUT, K_PAD - K_TAPS - 1), jnp.float32)],
        axis=1)                                                      # (32, 16)

    cost = pl.CostEstimate(
        flops=2 * C_OUT * K_PAD * N_OUT,                             # ~1.0e6
        transcendentals=0,
        bytes_accessed=4 * (K * STRIP_LEN + C_OUT * K_PAD + C_OUT * N_OUT),
    )

    out_flat = pl.pallas_call(
        conv_kernel,
        out_shape=jax.ShapeDtypeStruct((C_OUT, N_OUT), jnp.float32),
        in_specs=[
            pl.BlockSpec(memory_space=pltpu.MemorySpace.VMEM),       # strips
            pl.BlockSpec(memory_space=pltpu.MemorySpace.VMEM),       # w_aug
        ],
        out_specs=pl.BlockSpec(memory_space=pltpu.MemorySpace.VMEM),
        scratch_shapes=[pltpu.VMEM((K_PAD, N_OUT), jnp.float32)],
        cost_estimate=cost,
    )(strips, w_aug)

    # (32, 1024) -> (1, 32, 32, 32) NCHW (free row-major bitcast).
    return out_flat.reshape(C_OUT, H_OUT, W_OUT)[None]


@jax.jit
def reference_forward(x_nchw, weight, bias):
    """Pure-JAX reference (lax conv) for correctness checking."""
    out = lax.conv_general_dilated(
        x_nchw.astype(jnp.float32),
        weight.astype(jnp.float32),
        window_strides=(1, 1),
        padding=((PAD, PAD), (PAD, PAD)),
        rhs_dilation=(DIL, DIL),
        dimension_numbers=("NCHW", "OIHW", "NCHW"),
        precision=lax.Precision.HIGHEST,
    )
    out = out + bias[None, :, None, None]
    for s in SUB_CONSTS:
        out = out - jnp.float32(s)
    return out


if __name__ == "__main__":
    key = jax.random.PRNGKey(0)
    kx, kw, kb = jax.random.split(key, 3)

    # Deterministic synthetic parameters (Conv2d(1, 32, 3) shapes).
    weight = jax.random.normal(kw, (C_OUT, 1, K, K), dtype=jnp.float32) * 0.1
    bias = jax.random.normal(kb, (C_OUT,), dtype=jnp.float32) * 0.1

    # Input matching the module's usage: (1, 1, 30, 30).
    x = jax.random.normal(kx, (1, 1, H_IN, W_IN), dtype=jnp.float32)

    out = jax.block_until_ready(model_forward(x, weight, bias))
    ref = jax.block_until_ready(reference_forward(x, weight, bias))

    assert out.shape == (1, C_OUT, H_OUT, W_OUT), out.shape
    assert jnp.allclose(out, ref, atol=1e-5, rtol=1e-5), float(
        jnp.max(jnp.abs(out - ref)))

    print("KERNEL_OK")
</pallas_src>

<mosaic_0001>
module attributes {stable_mosaic.version = 11 : i64} {
  func.func @conv_kernel(%arg0: memref<3x1152xf32, #tpu.memory_space<vmem>>, %arg1: memref<32x16xf32, #tpu.memory_space<vmem>>, %arg2: memref<32x1024xf32, #tpu.memory_space<vmem>>, %arg3: memref<16x1024xf32, #tpu.memory_space<vmem>>) attributes {dimension_semantics = [], scalar_prefetch = 0 : i64, scratch_operands = 1 : i64, tpu.core_type = #tpu.core_type<tc>} {
    %cst = arith.constant 0.000000e+00 : f32
    %0 = vector.broadcast %cst : f32 to vector<16x1024xf32>
    %c0 = arith.constant 0 : index
    %c0_0 = arith.constant 0 : index
    %1 = vector.load %arg3[%c0, %c0_0] : memref<16x1024xf32, #tpu.memory_space<vmem>>, vector<16x1024xf32>
    tpu.vector_store %arg3[%c0, %c0_0], %0 {strides = array<i32>} : memref<16x1024xf32, #tpu.memory_space<vmem>>, vector<16x1024xf32>,
    %cst_1 = arith.constant 1.000000e+00 : f32
    %2 = vector.broadcast %cst_1 : f32 to vector<1x1024xf32>
    %c9 = arith.constant 9 : index
    %c0_2 = arith.constant 0 : index
    %3 = vector.load %arg3[%c9, %c0_2] : memref<16x1024xf32, #tpu.memory_space<vmem>>, vector<1x1024xf32>
    tpu.vector_store %arg3[%c9, %c0_2], %2 {strides = array<i32>} : memref<16x1024xf32, #tpu.memory_space<vmem>>, vector<1x1024xf32>,
    %c0_3 = arith.constant 0 : index
    %c0_4 = arith.constant 0 : index
    %4 = vector.load %arg0[%c0_3, %c0_4] : memref<3x1152xf32, #tpu.memory_space<vmem>>, vector<1x1024xf32>
    %c0_5 = arith.constant 0 : index
    %c0_6 = arith.constant 0 : index
    %5 = vector.load %arg3[%c0_5, %c0_6] : memref<16x1024xf32, #tpu.memory_space<vmem>>, vector<1x1024xf32>
    tpu.vector_store %arg3[%c0_5, %c0_6], %4 {strides = array<i32>} : memref<16x1024xf32, #tpu.memory_space<vmem>>, vector<1x1024xf32>,
    %c1 = arith.constant 1 : index
    %c0_7 = arith.constant 0 : index
    %6 = vector.load %arg0[%c1, %c0_7] : memref<3x1152xf32, #tpu.memory_space<vmem>>, vector<1x1024xf32>
    %c1_8 = arith.constant 1 : index
    %c0_9 = arith.constant 0 : index
    %7 = vector.load %arg3[%c1_8, %c0_9] : memref<16x1024xf32, #tpu.memory_space<vmem>>, vector<1x1024xf32>
    tpu.vector_store %arg3[%c1_8, %c0_9], %6 {strides = array<i32>} : memref<16x1024xf32, #tpu.memory_space<vmem>>, vector<1x1024xf32>,
    %c2 = arith.constant 2 : index
    %c0_10 = arith.constant 0 : index
    %8 = vector.load %arg0[%c2, %c0_10] : memref<3x1152xf32, #tpu.memory_space<vmem>>, vector<1x1024xf32>
    %c2_11 = arith.constant 2 : index
    %c0_12 = arith.constant 0 : index
    %9 = vector.load %arg3[%c2_11, %c0_12] : memref<16x1024xf32, #tpu.memory_space<vmem>>, vector<1x1024xf32>
    tpu.vector_store %arg3[%c2_11, %c0_12], %8 {strides = array<i32>} : memref<16x1024xf32, #tpu.memory_space<vmem>>, vector<1x1024xf32>,
    %c0_13 = arith.constant 0 : index
    %c64 = arith.constant 64 : index
    %10 = vector.load %arg0[%c0_13, %c64] : memref<3x1152xf32, #tpu.memory_space<vmem>>, vector<1x1024xf32>
    %c3 = arith.constant 3 : index
    %c0_14 = arith.constant 0 : index
    %11 = vector.load %arg3[%c3, %c0_14] : memref<16x1024xf32, #tpu.memory_space<vmem>>, vector<1x1024xf32>
    tpu.vector_store %arg3[%c3, %c0_14], %10 {strides = array<i32>} : memref<16x1024xf32, #tpu.memory_space<vmem>>, vector<1x1024xf32>,
    %c1_15 = arith.constant 1 : index
    %c64_16 = arith.constant 64 : index
    %12 = vector.load %arg0[%c1_15, %c64_16] : memref<3x1152xf32, #tpu.memory_space<vmem>>, vector<1x1024xf32>
    %c4 = arith.constant 4 : index
    %c0_17 = arith.constant 0 : index
    %13 = vector.load %arg3[%c4, %c0_17] : memref<16x1024xf32, #tpu.memory_space<vmem>>, vector<1x1024xf32>
    tpu.vector_store %arg3[%c4, %c0_17], %12 {strides = array<i32>} : memref<16x1024xf32, #tpu.memory_space<vmem>>, vector<1x1024xf32>,
    %c2_18 = arith.constant 2 : index
    %c64_19 = arith.constant 64 : index
    %14 = vector.load %arg0[%c2_18, %c64_19] : memref<3x1152xf32, #tpu.memory_space<vmem>>, vector<1x1024xf32>
    %c5 = arith.constant 5 : index
    %c0_20 = arith.constant 0 : index
    %15 = vector.load %arg3[%c5, %c0_20] : memref<16x1024xf32, #tpu.memory_space<vmem>>, vector<1x1024xf32>
    tpu.vector_store %arg3[%c5, %c0_20], %14 {strides = array<i32>} : memref<16x1024xf32, #tpu.memory_space<vmem>>, vector<1x1024xf32>,
    %c0_21 = arith.constant 0 : index
    %c128 = arith.constant 128 : index
    %16 = vector.load %arg0[%c0_21, %c128] : memref<3x1152xf32, #tpu.memory_space<vmem>>, vector<1x1024xf32>
    %c6 = arith.constant 6 : index
    %c0_22 = arith.constant 0 : index
    %17 = vector.load %arg3[%c6, %c0_22] : memref<16x1024xf32, #tpu.memory_space<vmem>>, vector<1x1024xf32>
    tpu.vector_store %arg3[%c6, %c0_22], %16 {strides = array<i32>} : memref<16x1024xf32, #tpu.memory_space<vmem>>, vector<1x1024xf32>,
    %c1_23 = arith.constant 1 : index
    %c128_24 = arith.constant 128 : index
    %18 = vector.load %arg0[%c1_23, %c128_24] : memref<3x1152xf32, #tpu.memory_space<vmem>>, vector<1x1024xf32>
    %c7 = arith.constant 7 : index
    %c0_25 = arith.constant 0 : index
    %19 = vector.load %arg3[%c7, %c0_25] : memref<16x1024xf32, #tpu.memory_space<vmem>>, vector<1x1024xf32>
    tpu.vector_store %arg3[%c7, %c0_25], %18 {strides = array<i32>} : memref<16x1024xf32, #tpu.memory_space<vmem>>, vector<1x1024xf32>,
    %c2_26 = arith.constant 2 : index
    %c128_27 = arith.constant 128 : index
    %20 = vector.load %arg0[%c2_26, %c128_27] : memref<3x1152xf32, #tpu.memory_space<vmem>>, vector<1x1024xf32>
    %c8 = arith.constant 8 : index
    %c0_28 = arith.constant 0 : index
    %21 = vector.load %arg3[%c8, %c0_28] : memref<16x1024xf32, #tpu.memory_space<vmem>>, vector<1x1024xf32>
    tpu.vector_store %arg3[%c8, %c0_28], %20 {strides = array<i32>} : memref<16x1024xf32, #tpu.memory_space<vmem>>, vector<1x1024xf32>,
    %c0_29 = arith.constant 0 : index
    %c0_30 = arith.constant 0 : index
    %22 = vector.load %arg1[%c0_29, %c0_30] : memref<32x16xf32, #tpu.memory_space<vmem>>, vector<32x16xf32>
    %c0_31 = arith.constant 0 : index
    %c0_32 = arith.constant 0 : index
    %23 = vector.load %arg3[%c0_31, %c0_32] : memref<16x1024xf32, #tpu.memory_space<vmem>>, vector<16x1024xf32>
    %cst_33 = arith.constant dense<0.000000e+00> : vector<32x1024xf32>
    %24 = tpu.matmul %22, %23, %cst_33 {dimension_numbers = #tpu.dot_dimension_numbers<[1], [0], [0], [1], [0, 0, 1, 1], [], []>} : vector<32x16xf32>, vector<16x1024xf32>, vector<32x1024xf32> -> vector<32x1024xf32>
    %c0_34 = arith.constant 0 : index
    %c0_35 = arith.constant 0 : index
    %25 = vector.load %arg2[%c0_34, %c0_35] : memref<32x1024xf32, #tpu.memory_space<vmem>>, vector<32x1024xf32>
    tpu.vector_store %arg2[%c0_34, %c0_35], %24 {strides = array<i32>} : memref<32x1024xf32, #tpu.memory_space<vmem>>, vector<32x1024xf32>,
    return
  }
}

</mosaic_0001>

<bundles_post_ra>
// kernel: model_forward.1
= control target key start
LH: loop header
LB: loop body
LE: loop exit
PB: predicated region body
PF: predicated region fallthrough
CT: control target
= control target key end

     0   :  { %s457_s15 = smov 64   ;;  %v458_v6 = vmov 0.0   ;;  %v459_v9 = vmov 1.0   ;;  %vm54_vm0 = vcmask 1046528   ;;  %vm56_vm1 = vcmask 523264   ;;  %s657_s0 = inlined_call_operand.vmem [shape: f32[3,1152], index: 0, kind: input, shape index: {}]   ;;  %s658_s1 = inlined_call_operand.vmem [shape: f32[32,16], index: 1, kind: input, shape index: {}]   ;;  %s659_s2 = inlined_call_operand.vmem [shape: f32[32,1024], index: 2, kind: output, shape index: {}]  }
   0x1   :  { %v415_v0 = vld [vmem:[%s657_s0 + $0x1] ss:$4 sm:$0xff]  ;;  %v43_v1 = vld [vmem:[%s657_s0] ss:$4 sm:$0xff]  ;;  %v417_v2 = vld [vmem:[%s657_s0 + $0x2] ss:$4 sm:$0xff] }
   0x2   :  { %67 = vrot.lane.b32.xlu1 %v415_v0, %s457_s15  ;;  %48 = vrot.lane.b32.xlu0 %v43_v1, %s457_s15  ;;  %v416_v3 = vld [vmem:[%s657_s0 + $0x21] ss:$4 sm:$0x1]  ;;  %v414_v4 = vld [vmem:[%s657_s0 + $0x20] ss:$4 sm:$0x1] }
   0x3   :  { %84 = vrot.lane.b32.xlu2 %v417_v2, %s457_s15  ;;  %v418_v5 = vld [vmem:[%s657_s0 + $0x22] ss:$4 sm:$0x1]  ;;  %11 = vst [vmem:[#allocation2] sm:$0xff] %v458_v6  ;;  %v30_v10 = vld [vmem:[%s657_s0] ss:$4 sm:$0xff] }
   0x4   :  { %12 = vst [vmem:[#allocation2 + $0x8] sm:$0xff] %v458_v6  ;;  %v421_v8 = vld [vmem:[%s657_s0 + $0x6] ss:$4 sm:$0xff]  ;;  %v412_v12 = vld [vmem:[%s657_s0 + $0x1] ss:$4 sm:$0xff]  ;;  %vm131_vm2 = vcmask 130048  }
   0x5   :  { %13 = vst [vmem:[#allocation2 + $0x10] sm:$0xff] %v458_v6  ;;  %v413_v14 = vld [vmem:[%s657_s0 + $0x2] ss:$4 sm:$0xff]  ;;  %v419_v16 = vld [vmem:[%s657_s0 + $0x4] ss:$4 sm:$0xff] }
   0x6   :  { %14 = vst [vmem:[#allocation2 + $0x18] sm:$0xff] %v458_v6  ;;  %v420_v19 = vld [vmem:[%s657_s0 + $0x5] ss:$4 sm:$0xff] }
   0x7   :  { %15 = vst [vmem:[#allocation2 + $0x20] sm:$0xff] %v458_v6  ;;  %v111_v36 = vld [vmem:[%s658_s1] sm:$0xff]  ;;  %v112_v49 = vld [vmem:[%s658_s1 + $0x8] sm:$0xff]  ;;  %v113_v50 = vld [vmem:[%s658_s1 + $0x10] sm:$0xff] }
   0x8   :  { %16 = vst [vmem:[#allocation2 + $0x28] sm:$0xff] %v458_v6  ;;  %v114_v51 = vld [vmem:[%s658_s1 + $0x18] sm:$0xff] }
   0x9   :  { %17 = vst [vmem:[#allocation2 + $0x30] sm:$0xff] %v458_v6 }
   0xa   :  { %69 = vrot.lane.b32.xlu1 %v416_v3, %s457_s15  ;;  %50 = vrot.lane.b32.xlu0 %v414_v4, %s457_s15  ;;  %18 = vst [vmem:[#allocation2 + $0x38] sm:$0xff] %v458_v6 }
   0xb   :  { %86 = vrot.lane.b32.xlu2 %v418_v5, %s457_s15  ;;  %19 = vst [vmem:[#allocation2 + $0x40] sm:$0xff] %v458_v6 }
   0xc   :  { %20 = vst [vmem:[#allocation2 + $0x48] sm:$0xff] %v458_v6 }
   0xd   :  { %21 = vst [vmem:[#allocation2 + $0x50] sm:$0xff] %v458_v6 }
   0xe   :  { %22 = vst [vmem:[#allocation2 + $0x58] sm:$0xff] %v458_v6 }
   0xf   :  { %23 = vst [vmem:[#allocation2 + $0x60] sm:$0xff] %v458_v6 }
  0x10   :  { %24 = vst [vmem:[#allocation2 + $0x68] sm:$0xff] %v458_v6 }
  0x11   :  { %25 = vst [vmem:[#allocation2 + $0x70] sm:$0xff] %v458_v6 }
  0x12   :  { %26 = vst [vmem:[#allocation2 + $0x78] sm:$0xff] %v458_v6 }
  0x13   :  { %28 = vst [vmem:[#allocation2 + $0x41] ss:$8 sm:$0xf] %v459_v9 }
  0x14   :  { %109 = vst [vmem:[#allocation2 + $0x40] ss:$8 sm:$0xf] %v421_v8 }
  0x15   :  { %29 = vst [vmem:[#allocation2 + $0x41] ss:$8 sm:$0xf0] %v459_v9 }
  0x16   :  { %110 = vst [vmem:[#allocation2 + $0x40] ss:$8 sm:$0xf0] %v421_v8 }
  0x17   :  { %31 = vst [vmem:[#allocation2] ss:$8 sm:$0xf] %v30_v10 }
  0x18   :  { %36 = vst [vmem:[#allocation2 + $0x1] ss:$8 sm:$0xf] %v412_v12 }
  0x19   :  { %41 = vst [vmem:[#allocation2 + $0x2] ss:$8 sm:$0xf] %v413_v14 }
  0x1a   :  { %99 = vst [vmem:[#allocation2 + $0x6] ss:$8 sm:$0xf] %v419_v16 }
  0x1b   :  { %v123_v20 = vld [vmem:[#allocation2 + $0x40] sm:$0xff]  ;;  %v124_v21 = vld [vmem:[#allocation2 + $0x48] sm:$0xff]  ;;  %v125_v22 = vld [vmem:[#allocation2 + $0x50] sm:$0xff]  ;;  %104 = vst [vmem:[#allocation2 + $0x7] ss:$8 sm:$0xf] %v420_v19 }
  0x1c   :  { %158 = vmatpush.msra.mxu0 %v123_v20  ;;  %187 = vmatpush.msra.mxu1 %v124_v21  ;;  %v126_v23 = vld [vmem:[#allocation2 + $0x58] sm:$0xff]  ;;  %32 = vst [vmem:[#allocation2] ss:$8 sm:$0xf0] %v30_v10 }
  0x1d   :  { %216 = vmatpush.msra.mxu2 %v125_v22  ;;  %245 = vmatpush.msra.mxu3 %v126_v23  ;;  %37 = vst [vmem:[#allocation2 + $0x1] ss:$8 sm:$0xf0] %v412_v12  ;;  %v127_v41 = vld [vmem:[#allocation2 + $0x60] sm:$0xff]  ;;  %v128_v42 = vld [vmem:[#allocation2 + $0x68] sm:$0xff]  ;;  %v129_v43 = vld [vmem:[#allocation2 + $0x70] sm:$0xff] }
  0x1e   :  { %42 = vst [vmem:[#allocation2 + $0x2] ss:$8 sm:$0xf0] %v413_v14  ;;  %v130_v44 = vld [vmem:[#allocation2 + $0x78] sm:$0xff] }
  0x1f   :  { %100 = vst [vmem:[#allocation2 + $0x6] ss:$8 sm:$0xf0] %v419_v16 }
  0x20   :  { %105 = vst [vmem:[#allocation2 + $0x7] ss:$8 sm:$0xf0] %v420_v19 }
  0x5d   :  { %v85_v7 = vpop.permute.xlu2 %84 }
  0x5e   :  { %v88_v11 = vrot.slane %v85_v7, 1 }
  0x65   :  { %v87_v13 = vpop.permute.xlu2 %86 }
  0x66   :  { %v89_v15 = vrot.slane %v87_v13, 1 }
  0x68   :  { %v90_v17 = vsel %vm54_vm0, %v88_v11, %v89_v15 }
  0x69   :  { %v91_v18 = vsel %vm56_vm1, %v85_v7, %v90_v17 }
  0x6a   :  { %94 = vst [vmem:[#allocation2 + $0x5] ss:$8 sm:$0xf] %v91_v18 }
  0x6b   :  { %95 = vst [vmem:[#allocation2 + $0x5] ss:$8 sm:$0xf0] %v91_v18 }
  0x74   :  { %v68_v24 = vpop.permute.xlu1 %67  ;;  %v49_v25 = vpop.permute.xlu0 %48 }
  0x75   :  { %v71_v28 = vrot.slane %v68_v24, 1  ;;  %v52_v29 = vrot.slane %v49_v25, 1 }
  0x7c   :  { %v70_v26 = vpop.permute.xlu1 %69  ;;  %v51_v27 = vpop.permute.xlu0 %50 }
  0x7d   :  { %v72_v30 = vrot.slane %v70_v26, 1  ;;  %v53_v31 = vrot.slane %v51_v27, 1 }
  0x7f   :  { %v73_v32 = vsel %vm54_vm0, %v71_v28, %v72_v30  ;;  %v55_v33 = vsel %vm54_vm0, %v52_v29, %v53_v31 }
  0x80   :  { %v74_v34 = vsel %vm56_vm1, %v68_v24, %v73_v32  ;;  %v57_v35 = vsel %vm56_vm1, %v49_v25, %v55_v33 }
  0x81   :  { %77 = vst [vmem:[#allocation2 + $0x4] ss:$8 sm:$0xf] %v74_v34 }
  0x82   :  { %78 = vst [vmem:[#allocation2 + $0x4] ss:$8 sm:$0xf0] %v74_v34 }
  0x83   :  { %60 = vst [vmem:[#allocation2 + $0x3] ss:$8 sm:$0xf] %v57_v35 }
  0x84   :  { %61 = vst [vmem:[#allocation2 + $0x3] ss:$8 sm:$0xf0] %v57_v35 }
  0x8a   :  { %v115_v37 = vld [vmem:[#allocation2] sm:$0xff]  ;;  %v116_v38 = vld [vmem:[#allocation2 + $0x8] sm:$0xff]  ;;  %v117_v39 = vld [vmem:[#allocation2 + $0x10] sm:$0xff] }
  0x8b   :  { %159 = vmatpush.msra.mxu0 %v115_v37  ;;  %188 = vmatpush.msra.mxu1 %v116_v38  ;;  %v118_v40 = vld [vmem:[#allocation2 + $0x18] sm:$0xff]  ;;  %v119_v45 = vld [vmem:[#allocation2 + $0x20] sm:$0xff]  ;;  %v120_v46 = vld [vmem:[#allocation2 + $0x28] sm:$0xff] }
  0x8c   :  { %217 = vmatpush.msra.mxu2 %v117_v39  ;;  %246 = vmatpush.msra.mxu3 %v118_v40  ;;  %v121_v47 = vld [vmem:[#allocation2 + $0x30] sm:$0xff]  ;;  %v122_v48 = vld [vmem:[#allocation2 + $0x38] sm:$0xff] }
  0x8d   :  { %430 = vmatmul.msk.f32.vlgmr.msra.gmra.mxu2 %vm131_vm2, %v111_v36  ;;  %434 = vmatmul.msk.f32.vlgmr.msra.gmra.mxu3 %vm131_vm2, %v111_v36 }
  0x8e   :  { %274 = vmatpush.msrb.mxu0 %v127_v41  ;;  %303 = vmatpush.msrb.mxu1 %v128_v42 }
  0x8f   :  { %332 = vmatpush.msrb.mxu2 %v129_v43  ;;  %361 = vmatpush.msrb.mxu3 %v130_v44 }
  0x90   :  { %275 = vmatpush.msrb.mxu0 %v119_v45  ;;  %304 = vmatpush.msrb.mxu1 %v120_v46 }
  0x91   :  { %333 = vmatpush.msrb.mxu2 %v121_v47  ;;  %362 = vmatpush.msrb.mxu3 %v122_v48 }
  0x92   :  { %422 = vmatmul.msk.f32.vlgmr.msra.gmra.mxu0 %vm131_vm2, %v111_v36  ;;  %426 = vmatmul.msk.f32.vlgmr.msra.gmra.mxu1 %vm131_vm2, %v111_v36 }
  0x95   :  { %431 = vmatmul.msk.f32.gmra.mxu2 %vm131_vm2, %v112_v49  ;;  %435 = vmatmul.msk.f32.gmra.mxu3 %vm131_vm2, %v112_v49 }
  0x9a   :  { %423 = vmatmul.msk.f32.gmra.mxu0 %vm131_vm2, %v112_v49  ;;  %427 = vmatmul.msk.f32.gmra.mxu1 %vm131_vm2, %v112_v49 }
  0x9d   :  { %432 = vmatmul.msk.f32.gmra.mxu2 %vm131_vm2, %v113_v50  ;;  %436 = vmatmul.msk.f32.gmra.mxu3 %vm131_vm2, %v113_v50 }
  0xa2   :  { %424 = vmatmul.msk.f32.gmra.mxu0 %vm131_vm2, %v113_v50  ;;  %428 = vmatmul.msk.f32.gmra.mxu1 %vm131_vm2, %v113_v50 }
  0xa5   :  { %433 = vmatmul.msk.f32.gmra.mxu2 %vm131_vm2, %v114_v51  ;;  %437 = vmatmul.msk.f32.gmra.mxu3 %vm131_vm2, %v114_v51 }
  0xaa   :  { %425 = vmatmul.msk.f32.gmra.mxu0 %vm131_vm2, %v114_v51  ;;  %429 = vmatmul.msk.f32.gmra.mxu1 %vm131_vm2, %v114_v51 }
  0xad   :  { %446 = vmatmul.msk.f32.vlgmr.msrb.gmra.mxu2 %vm131_vm2, %v111_v36  ;;  %450 = vmatmul.msk.f32.vlgmr.msrb.gmra.mxu3 %vm131_vm2, %v111_v36 }
  0xb2   :  { %438 = vmatmul.msk.f32.vlgmr.msrb.gmra.mxu0 %vm131_vm2, %v111_v36  ;;  %442 = vmatmul.msk.f32.vlgmr.msrb.gmra.mxu1 %vm131_vm2, %v111_v36 }
  0xb5   :  { %447 = vmatmul.msk.f32.gmra.mxu2 %vm131_vm2, %v112_v49  ;;  %451 = vmatmul.msk.f32.gmra.mxu3 %vm131_vm2, %v112_v49 }
  0xba   :  { %439 = vmatmul.msk.f32.gmra.mxu0 %vm131_vm2, %v112_v49  ;;  %443 = vmatmul.msk.f32.gmra.mxu1 %vm131_vm2, %v112_v49 }
  0xbd   :  { %448 = vmatmul.msk.f32.gmra.mxu2 %vm131_vm2, %v113_v50  ;;  %452 = vmatmul.msk.f32.gmra.mxu3 %vm131_vm2, %v113_v50 }
  0xc2   :  { %440 = vmatmul.msk.f32.gmra.mxu0 %vm131_vm2, %v113_v50  ;;  %444 = vmatmul.msk.f32.gmra.mxu1 %vm131_vm2, %v113_v50 }
  0xc5   :  { %449 = vmatmul.msk.f32.gmra.mxu2 %vm131_vm2, %v114_v51  ;;  %453 = vmatmul.msk.f32.gmra.mxu3 %vm131_vm2, %v114_v51 }
  0xca   :  { %441 = vmatmul.msk.f32.gmra.mxu0 %vm131_vm2, %v114_v51  ;;  %445 = vmatmul.msk.f32.gmra.mxu1 %vm131_vm2, %v114_v51 }
 0x10f   :  { %v161_v52 = vpop.f32.mrf.mxu0  ;;  %v190_v53 = vpop.f32.mrf.mxu1 }
 0x110   :  { %376 = vst [vmem:[%s659_s2] sm:$0xff] %v161_v52  ;;  %v219_v54 = vpop.f32.mrf.mxu2  ;;  %v248_v55 = vpop.f32.mrf.mxu3 }
 0x111   :  { %377 = vst [vmem:[%s659_s2 + $0x8] sm:$0xff] %v190_v53 }
 0x112   :  { %378 = vst [vmem:[%s659_s2 + $0x10] sm:$0xff] %v219_v54 }
 0x113   :  { %379 = vst [vmem:[%s659_s2 + $0x18] sm:$0xff] %v248_v55 }
 0x117   :  { %v164_v56 = vpop.f32.mrf.mxu0  ;;  %v193_v57 = vpop.f32.mrf.mxu1 }
 0x118   :  { %384 = vst [vmem:[%s659_s2 + $0x40] sm:$0xff] %v164_v56  ;;  %v222_v58 = vpop.f32.mrf.mxu2  ;;  %v251_v59 = vpop.f32.mrf.mxu3 }
 0x119   :  { %385 = vst [vmem:[%s659_s2 + $0x48] sm:$0xff] %v193_v57 }
 0x11a   :  { %386 = vst [vmem:[%s659_s2 + $0x50] sm:$0xff] %v222_v58 }
 0x11b   :  { %387 = vst [vmem:[%s659_s2 + $0x58] sm:$0xff] %v251_v59 }
 0x11f   :  { %v167_v60 = vpop.f32.mrf.mxu0  ;;  %v196_v61 = vpop.f32.mrf.mxu1 }
 0x120   :  { %392 = vst [vmem:[%s659_s2 + $0x80] sm:$0xff] %v167_v60  ;;  %v225_v62 = vpop.f32.mrf.mxu2  ;;  %v254_v63 = vpop.f32.mrf.mxu3 }
 0x121   :  { %393 = vst [vmem:[%s659_s2 + $0x88] sm:$0xff] %v196_v61 }
 0x122   :  { %394 = vst [vmem:[%s659_s2 + $0x90] sm:$0xff] %v225_v62 }
 0x123   :  { %395 = vst [vmem:[%s659_s2 + $0x98] sm:$0xff] %v254_v63 }
 0x127   :  { %v170_v0 = vpop.f32.mrf.mxu0  ;;  %v199_v1 = vpop.f32.mrf.mxu1 }
 0x128   :  { %400 = vst [vmem:[%s659_s2 + $0xc0] sm:$0xff] %v170_v0  ;;  %v228_v2 = vpop.f32.mrf.mxu2  ;;  %v257_v3 = vpop.f32.mrf.mxu3 }
 0x129   :  { %401 = vst [vmem:[%s659_s2 + $0xc8] sm:$0xff] %v199_v1 }
 0x12a   :  { %402 = vst [vmem:[%s659_s2 + $0xd0] sm:$0xff] %v228_v2 }
 0x12b   :  { %403 = vst [vmem:[%s659_s2 + $0xd8] sm:$0xff] %v257_v3 }
 0x12f   :  { %v277_v4 = vpop.f32.mrf.mxu0  ;;  %v306_v5 = vpop.f32.mrf.mxu1 }
 0x130   :  { %380 = vst [vmem:[%s659_s2 + $0x20] sm:$0xff] %v277_v4  ;;  %v335_v6 = vpop.f32.mrf.mxu2  ;;  %v364_v7 = vpop.f32.mrf.mxu3 }
 0x131   :  { %381 = vst [vmem:[%s659_s2 + $0x28] sm:$0xff] %v306_v5 }
 0x132   :  { %382 = vst [vmem:[%s659_s2 + $0x30] sm:$0xff] %v335_v6 }
 0x133   :  { %383 = vst [vmem:[%s659_s2 + $0x38] sm:$0xff] %v364_v7 }
 0x137   :  { %v280_v8 = vpop.f32.mrf.mxu0  ;;  %v309_v9 = vpop.f32.mrf.mxu1 }
 0x138   :  { %388 = vst [vmem:[%s659_s2 + $0x60] sm:$0xff] %v280_v8  ;;  %v338_v10 = vpop.f32.mrf.mxu2  ;;  %v367_v11 = vpop.f32.mrf.mxu3 }
 0x139   :  { %389 = vst [vmem:[%s659_s2 + $0x68] sm:$0xff] %v309_v9 }
 0x13a   :  { %390 = vst [vmem:[%s659_s2 + $0x70] sm:$0xff] %v338_v10 }
 0x13b   :  { %391 = vst [vmem:[%s659_s2 + $0x78] sm:$0xff] %v367_v11 }
 0x13f   :  { %v283_v12 = vpop.f32.mrf.mxu0  ;;  %v312_v13 = vpop.f32.mrf.mxu1 }
 0x140   :  { %396 = vst [vmem:[%s659_s2 + $0xa0] sm:$0xff] %v283_v12  ;;  %v341_v14 = vpop.f32.mrf.mxu2  ;;  %v370_v15 = vpop.f32.mrf.mxu3 }
 0x141   :  { %397 = vst [vmem:[%s659_s2 + $0xa8] sm:$0xff] %v312_v13 }
 0x142   :  { %398 = vst [vmem:[%s659_s2 + $0xb0] sm:$0xff] %v341_v14 }
 0x143   :  { %399 = vst [vmem:[%s659_s2 + $0xb8] sm:$0xff] %v370_v15 }
 0x147   :  { %v286_v16 = vpop.f32.mrf.mxu0  ;;  %v315_v17 = vpop.f32.mrf.mxu1 }
 0x148   :  { %404 = vst [vmem:[%s659_s2 + $0xe0] sm:$0xff] %v286_v16  ;;  %v344_v18 = vpop.f32.mrf.mxu2  ;;  %v373_v19 = vpop.f32.mrf.mxu3 }
 0x149   :  { %405 = vst [vmem:[%s659_s2 + $0xe8] sm:$0xff] %v315_v17 }
 0x14a   :  { %406 = vst [vmem:[%s659_s2 + $0xf0] sm:$0xff] %v344_v18 }
 0x14b   :  { %407 = vst [vmem:[%s659_s2 + $0xf8] sm:$0xff] %v373_v19 }

</bundles_post_ra>
